<compile_context>
chip_gen: v5e
topology: v5e:2x2
jax: 0.10.0
libtpu: 0.0.40
codegen_flags: <defaults>
</compile_context>

<pallas_src>
import functools

import jax
import jax.numpy as jnp
from jax.experimental import pallas as pl
from jax.experimental.pallas import tpu as pltpu

K_IN = 784        # flattened 1*28*28
C_OUT = 10
C_PAD = 128       # logits computed 128-wide; padded lanes pre-masked via b4


def _round_up(x, m):
    return (x + m - 1) // m * m


def _mlp_kernel(x_ref,
                w1_ref, b1_ref,
                w2_ref, b2_ref,
                w3_ref, b3_ref,
                w4_ref, b4_ref,
                o_ref):
    # One batch tile (TM rows) through the whole fused MLP.
    x = x_ref[...]                                                   # (TM, 784) bf16

    h = jnp.dot(x, w1_ref[...], preferred_element_type=jnp.float32) + b1_ref[...]
    h = jnp.maximum(h, 0.0)

    h = jnp.dot(h.astype(jnp.bfloat16), w2_ref[...],
                preferred_element_type=jnp.float32) + b2_ref[...]
    h = jnp.maximum(h, 0.0)

    h = jnp.dot(h.astype(jnp.bfloat16), w3_ref[...],
                preferred_element_type=jnp.float32) + b3_ref[...]
    h = jnp.maximum(h, 0.0)

    logits = jnp.dot(h.astype(jnp.bfloat16), w4_ref[...],
                     preferred_element_type=jnp.float32) + b4_ref[...]  # (TM, 128)
    # Padded class lanes already hold -1e30 (baked into b4) -> no iota/where.

    # Numerically stable log_softmax along the class axis (f32).
    m = jnp.max(logits, axis=-1, keepdims=True)
    shifted = logits - m
    lse = jnp.log(jnp.sum(jnp.exp(shifted), axis=-1, keepdims=True))
    o_ref[...] = (shifted - lse)[:, :C_OUT]                          # (TM, 10)


def classifier_old_forward(x_nchw, params, *, tm=1024):
    """x_nchw: (N, 1, 28, 28) float32.  Returns (N, 10) log-probabilities."""
    n = x_nchw.shape[0]
    (w1, b1), (w2, b2), (w3, b3), (w4, b4) = params

    # Flatten and cast to bf16 BEFORE any padding so the wrapper never
    # materializes a padded f32 copy of the input.
    x = x_nchw.reshape(n, -1)
    assert x.shape[1] == K_IN, x.shape
    x = x.astype(jnp.bfloat16)                                       # (N, 784) bf16

    # Batch tile from the batch size: padding waste < 8 rows per tile, and at
    # least two grid steps for large batches so both v7x cores participate.
    grid = max(1, pl.cdiv(n, tm))
    if grid == 1 and n >= 512:
        grid = 2
    tm = _round_up(pl.cdiv(n, grid), 8)
    n_pad = grid * tm
    if n_pad != n:
        x = jnp.pad(x, ((0, n_pad - n), (0, 0)))

    # bf16 MXU operands; biases stay f32 (f32 accumulate / elementwise).
    w1b = w1.astype(jnp.bfloat16)
    w2b = w2.astype(jnp.bfloat16)
    w3b = w3.astype(jnp.bfloat16)
    # Classes 10 -> 128: zero weight columns + (-1e30) bias columns so the
    # padded logits come out of the bias add already masked.
    w4b = jnp.pad(w4, ((0, 0), (0, C_PAD - C_OUT))).astype(jnp.bfloat16)
    b4p = jnp.pad(b4, ((0, 0), (0, C_PAD - C_OUT)), constant_values=-1e30)

    const = lambda i: (0, 0)    # weights/biases: fetched once, VMEM-resident
    out = pl.pallas_call(
        _mlp_kernel,
        out_shape=jax.ShapeDtypeStruct((n_pad, C_OUT), jnp.float32),
        grid=(grid,),
        in_specs=[
            pl.BlockSpec((tm, K_IN), lambda i: (i, 0)),   # x tile (full 784 lanes)
            pl.BlockSpec((K_IN, 256), const),             # w1
            pl.BlockSpec((1, 256), const),                # b1
            pl.BlockSpec((256, 128), const),              # w2
            pl.BlockSpec((1, 128), const),                # b2
            pl.BlockSpec((128, 64), const),               # w3
            pl.BlockSpec((1, 64), const),                 # b3
            pl.BlockSpec((64, C_PAD), const),             # w4 (class-padded, zeros)
            pl.BlockSpec((1, C_PAD), const),              # b4 (class-padded, -1e30)
        ],
        out_specs=pl.BlockSpec((tm, C_OUT), lambda i: (i, 0)),   # narrow (tm, 10)
        compiler_params=pltpu.CompilerParams(
            dimension_semantics=("parallel",)),
    )(x, w1b, b1, w2b, b2, w3b, b3, w4b, b4p)

    return out if n_pad == n else out[:n]


def init_params(key):
    """Deterministic init matching the nn.Linear shapes.
    Weights stored as (in, out); biases as (1, out)."""
    dims = [(784, 256), (256, 128), (128, 64), (64, 10)]
    params = []
    for i, (din, dout) in enumerate(dims):
        kw, kb = jax.random.split(jax.random.fold_in(key, i))
        bound = 1.0 / (din ** 0.5)  # same scale as PyTorch's default Linear init
        w = jax.random.uniform(kw, (din, dout), jnp.float32, -bound, bound)
        b = jax.random.uniform(kb, (1, dout), jnp.float32, -bound, bound)
        params.append((w, b))
    return params


def _reference_forward(x_nchw, params):
    # Pure-JAX reference mirroring the kernel's bf16-operand / f32-accumulate
    # precision so tolerances can stay tight.
    x = x_nchw.reshape(x_nchw.shape[0], -1).astype(jnp.float32)
    bf = lambda a: a.astype(jnp.bfloat16).astype(jnp.float32)
    dot = functools.partial(jnp.dot, precision=jax.lax.Precision.HIGHEST)
    (w1, b1), (w2, b2), (w3, b3), (w4, b4) = params
    h = jnp.maximum(dot(bf(x), bf(w1)) + b1, 0.0)
    h = jnp.maximum(dot(bf(h), bf(w2)) + b2, 0.0)
    h = jnp.maximum(dot(bf(h), bf(w3)) + b3, 0.0)
    logits = dot(bf(h), bf(w4)) + b4
    return jax.nn.log_softmax(logits, axis=1)


if __name__ == "__main__":
    key = jax.random.PRNGKey(0)
    k_x, k_x2, k_p = jax.random.split(key, 3)
    params = init_params(k_p)

    # --- small single-tile check (batch=4, grid=1) ---
    batch = 4
    x = jax.random.normal(k_x, (batch, 1, 28, 28), jnp.float32)   # NCHW like PyTorch
    out = jax.block_until_ready(classifier_old_forward(x, params))
    ref = _reference_forward(x, params)
    assert out.shape == (batch, 10), out.shape
    assert jnp.allclose(out, ref, atol=1e-2, rtol=1e-2), "mismatch vs reference (small)"
    assert jnp.allclose(jnp.sum(jnp.exp(out), axis=1), 1.0, atol=1e-3)

    # --- multi-tile / batch-padding check (batch=40, tm target 16 -> 3 grid steps) ---
    batch2 = 40
    x2 = jax.random.normal(k_x2, (batch2, 1, 28, 28), jnp.float32)
    out2 = jax.block_until_ready(classifier_old_forward(x2, params, tm=16))
    ref2 = _reference_forward(x2, params)
    assert out2.shape == (batch2, 10), out2.shape
    assert jnp.allclose(out2, ref2, atol=1e-2, rtol=1e-2), "mismatch vs reference (multi-tile)"
    assert jnp.allclose(jnp.sum(jnp.exp(out2), axis=1), 1.0, atol=1e-3)

    print("KERNEL_OK")
</pallas_src>

<mosaic_0001>
module attributes {stable_mosaic.version = 11 : i64} {
  func.func @_mlp_kernel(%arg0: i32, %arg1: memref<8x784xbf16, #tpu.memory_space<vmem>>, %arg2: memref<784x256xbf16, #tpu.memory_space<vmem>>, %arg3: memref<1x256xf32, #tpu.memory_space<vmem>>, %arg4: memref<256x128xbf16, #tpu.memory_space<vmem>>, %arg5: memref<1x128xf32, #tpu.memory_space<vmem>>, %arg6: memref<128x64xbf16, #tpu.memory_space<vmem>>, %arg7: memref<1x64xf32, #tpu.memory_space<vmem>>, %arg8: memref<64x128xbf16, #tpu.memory_space<vmem>>, %arg9: memref<1x128xf32, #tpu.memory_space<vmem>>, %arg10: memref<8x10xf32, #tpu.memory_space<vmem>>) attributes {dimension_semantics = [#tpu.dimension_semantics<parallel>], iteration_bounds = array<i64: 1>, scalar_prefetch = 0 : i64, scratch_operands = 0 : i64, tpu.core_type = #tpu.core_type<tc>, window_params = [{transform_indices = @transform_0, window_bounds = array<i64: 8, 784>}, {pipeline_mode = #tpu.pipeline_mode<synchronous>, transform_indices = @transform_1, window_bounds = array<i64: 784, 256>}, {pipeline_mode = #tpu.pipeline_mode<synchronous>, transform_indices = @transform_2, window_bounds = array<i64: 1, 256>}, {pipeline_mode = #tpu.pipeline_mode<synchronous>, transform_indices = @transform_3, window_bounds = array<i64: 256, 128>}, {pipeline_mode = #tpu.pipeline_mode<synchronous>, transform_indices = @transform_4, window_bounds = array<i64: 1, 128>}, {pipeline_mode = #tpu.pipeline_mode<synchronous>, transform_indices = @transform_5, window_bounds = array<i64: 128, 64>}, {pipeline_mode = #tpu.pipeline_mode<synchronous>, transform_indices = @transform_6, window_bounds = array<i64: 1, 64>}, {pipeline_mode = #tpu.pipeline_mode<synchronous>, transform_indices = @transform_7, window_bounds = array<i64: 64, 128>}, {pipeline_mode = #tpu.pipeline_mode<synchronous>, transform_indices = @transform_8, window_bounds = array<i64: 1, 128>}, {transform_indices = @transform_9, window_bounds = array<i64: 8, 10>}]} {
    %c0 = arith.constant 0 : index
    %c0_0 = arith.constant 0 : index
    %0 = vector.load %arg1[%c0, %c0_0] : memref<8x784xbf16, #tpu.memory_space<vmem>>, vector<8x784xbf16>
    %c0_1 = arith.constant 0 : index
    %c0_2 = arith.constant 0 : index
    %1 = vector.load %arg2[%c0_1, %c0_2] : memref<784x256xbf16, #tpu.memory_space<vmem>>, vector<784x256xbf16>
    %cst = arith.constant dense<0.000000e+00> : vector<8x256xf32>
    %2 = tpu.matmul %0, %1, %cst {dimension_numbers = #tpu.dot_dimension_numbers<[1], [0], [0], [1], [0, 0, 1, 1], [], []>} : vector<8x784xbf16>, vector<784x256xbf16>, vector<8x256xf32> -> vector<8x256xf32>
    %c0_3 = arith.constant 0 : index
    %c0_4 = arith.constant 0 : index
    %3 = vector.load %arg3[%c0_3, %c0_4] : memref<1x256xf32, #tpu.memory_space<vmem>>, vector<1x256xf32>
    %4 = vector.broadcast %3 : vector<1x256xf32> to vector<8x256xf32>
    %5 = arith.addf %2, %4 : vector<8x256xf32>
    %cst_5 = arith.constant 0.000000e+00 : f32
    %6 = vector.broadcast %cst_5 : f32 to vector<8x256xf32>
    %7 = arith.maximumf %5, %6 : vector<8x256xf32>
    %8 = arith.truncf %7 : vector<8x256xf32> to vector<8x256xbf16>
    %c0_6 = arith.constant 0 : index
    %c0_7 = arith.constant 0 : index
    %9 = vector.load %arg4[%c0_6, %c0_7] : memref<256x128xbf16, #tpu.memory_space<vmem>>, vector<256x128xbf16>
    %cst_8 = arith.constant dense<0.000000e+00> : vector<8x128xf32>
    %10 = tpu.matmul %8, %9, %cst_8 {dimension_numbers = #tpu.dot_dimension_numbers<[1], [0], [0], [1], [0, 0, 1, 1], [], []>} : vector<8x256xbf16>, vector<256x128xbf16>, vector<8x128xf32> -> vector<8x128xf32>
    %c0_9 = arith.constant 0 : index
    %c0_10 = arith.constant 0 : index
    %11 = vector.load %arg5[%c0_9, %c0_10] : memref<1x128xf32, #tpu.memory_space<vmem>>, vector<1x128xf32>
    %12 = vector.broadcast %11 : vector<1x128xf32> to vector<8x128xf32>
    %13 = arith.addf %10, %12 : vector<8x128xf32>
    %cst_11 = arith.constant 0.000000e+00 : f32
    %14 = vector.broadcast %cst_11 : f32 to vector<8x128xf32>
    %15 = arith.maximumf %13, %14 : vector<8x128xf32>
    %16 = arith.truncf %15 : vector<8x128xf32> to vector<8x128xbf16>
    %c0_12 = arith.constant 0 : index
    %c0_13 = arith.constant 0 : index
    %17 = vector.load %arg6[%c0_12, %c0_13] : memref<128x64xbf16, #tpu.memory_space<vmem>>, vector<128x64xbf16>
    %cst_14 = arith.constant dense<0.000000e+00> : vector<8x64xf32>
    %18 = tpu.matmul %16, %17, %cst_14 {dimension_numbers = #tpu.dot_dimension_numbers<[1], [0], [0], [1], [0, 0, 1, 1], [], []>} : vector<8x128xbf16>, vector<128x64xbf16>, vector<8x64xf32> -> vector<8x64xf32>
    %c0_15 = arith.constant 0 : index
    %c0_16 = arith.constant 0 : index
    %19 = vector.load %arg7[%c0_15, %c0_16] : memref<1x64xf32, #tpu.memory_space<vmem>>, vector<1x64xf32>
    %20 = vector.broadcast %19 : vector<1x64xf32> to vector<8x64xf32>
    %21 = arith.addf %18, %20 : vector<8x64xf32>
    %cst_17 = arith.constant 0.000000e+00 : f32
    %22 = vector.broadcast %cst_17 : f32 to vector<8x64xf32>
    %23 = arith.maximumf %21, %22 : vector<8x64xf32>
    %24 = arith.truncf %23 : vector<8x64xf32> to vector<8x64xbf16>
    %c0_18 = arith.constant 0 : index
    %c0_19 = arith.constant 0 : index
    %25 = vector.load %arg8[%c0_18, %c0_19] : memref<64x128xbf16, #tpu.memory_space<vmem>>, vector<64x128xbf16>
    %cst_20 = arith.constant dense<0.000000e+00> : vector<8x128xf32>
    %26 = tpu.matmul %24, %25, %cst_20 {dimension_numbers = #tpu.dot_dimension_numbers<[1], [0], [0], [1], [0, 0, 1, 1], [], []>} : vector<8x64xbf16>, vector<64x128xbf16>, vector<8x128xf32> -> vector<8x128xf32>
    %c0_21 = arith.constant 0 : index
    %c0_22 = arith.constant 0 : index
    %27 = vector.load %arg9[%c0_21, %c0_22] : memref<1x128xf32, #tpu.memory_space<vmem>>, vector<1x128xf32>
    %28 = vector.broadcast %27 : vector<1x128xf32> to vector<8x128xf32>
    %29 = arith.addf %26, %28 : vector<8x128xf32>
    %cst_23 = arith.constant dense<0xFF800000> : vector<8xf32>
    %30 = vector.multi_reduction <maximumf>, %29, %cst_23 [1] : vector<8x128xf32> to vector<8xf32>
    %31 = vector.shape_cast %30 : vector<8xf32> to vector<8x1xf32>
    %32 = vector.broadcast %31 : vector<8x1xf32> to vector<8x128xf32>
    %33 = arith.subf %29, %32 : vector<8x128xf32>
    %34 = math.exp %33 : vector<8x128xf32>
    %cst_24 = arith.constant dense<0.000000e+00> : vector<8xf32>
    %35 = vector.multi_reduction <add>, %34, %cst_24 [1] : vector<8x128xf32> to vector<8xf32>
    %36 = vector.shape_cast %35 : vector<8xf32> to vector<8x1xf32>
    %37 = math.log %36 : vector<8x1xf32>
    %38 = vector.broadcast %37 : vector<8x1xf32> to vector<8x128xf32>
    %39 = arith.subf %33, %38 : vector<8x128xf32>
    %40 = vector.extract_strided_slice %39 {offsets = [0, 0], sizes = [8, 10], strides = [1, 1]} : vector<8x128xf32> to vector<8x10xf32>
    %c0_25 = arith.constant 0 : index
    %c0_26 = arith.constant 0 : index
    %41 = vector.load %arg10[%c0_25, %c0_26] : memref<8x10xf32, #tpu.memory_space<vmem>>, vector<8x10xf32>
    tpu.vector_store %arg10[%c0_25, %c0_26], %40 {strides = array<i32>} : memref<8x10xf32, #tpu.memory_space<vmem>>, vector<8x10xf32>,
    return
  }
  func.func @transform_0(%arg0: i32) -> (i32, i32) {
    %c0_i32 = arith.constant 0 : i32
    %c0_i32_0 = arith.constant 0 : i32
    return %arg0, %c0_i32 : i32, i32
  }
  func.func @transform_1(%arg0: i32) -> (i32, i32) {
    %c0_i32 = arith.constant 0 : i32
    %c0_i32_0 = arith.constant 0 : i32
    %c0_i32_1 = arith.constant 0 : i32
    return %c0_i32, %c0_i32_0 : i32, i32
  }
  func.func @transform_2(%arg0: i32) -> (i32, i32) {
    %c0_i32 = arith.constant 0 : i32
    %c0_i32_0 = arith.constant 0 : i32
    %c0_i32_1 = arith.constant 0 : i32
    return %c0_i32, %c0_i32_0 : i32, i32
  }
  func.func @transform_3(%arg0: i32) -> (i32, i32) {
    %c0_i32 = arith.constant 0 : i32
    %c0_i32_0 = arith.constant 0 : i32
    %c0_i32_1 = arith.constant 0 : i32
    return %c0_i32, %c0_i32_0 : i32, i32
  }
  func.func @transform_4(%arg0: i32) -> (i32, i32) {
    %c0_i32 = arith.constant 0 : i32
    %c0_i32_0 = arith.constant 0 : i32
    %c0_i32_1 = arith.constant 0 : i32
    return %c0_i32, %c0_i32_0 : i32, i32
  }
  func.func @transform_5(%arg0: i32) -> (i32, i32) {
    %c0_i32 = arith.constant 0 : i32
    %c0_i32_0 = arith.constant 0 : i32
    %c0_i32_1 = arith.constant 0 : i32
    return %c0_i32, %c0_i32_0 : i32, i32
  }
  func.func @transform_6(%arg0: i32) -> (i32, i32) {
    %c0_i32 = arith.constant 0 : i32
    %c0_i32_0 = arith.constant 0 : i32
    %c0_i32_1 = arith.constant 0 : i32
    return %c0_i32, %c0_i32_0 : i32, i32
  }
  func.func @transform_7(%arg0: i32) -> (i32, i32) {
    %c0_i32 = arith.constant 0 : i32
    %c0_i32_0 = arith.constant 0 : i32
    %c0_i32_1 = arith.constant 0 : i32
    return %c0_i32, %c0_i32_0 : i32, i32
  }
  func.func @transform_8(%arg0: i32) -> (i32, i32) {
    %c0_i32 = arith.constant 0 : i32
    %c0_i32_0 = arith.constant 0 : i32
    %c0_i32_1 = arith.constant 0 : i32
    return %c0_i32, %c0_i32_0 : i32, i32
  }
  func.func @transform_9(%arg0: i32) -> (i32, i32) {
    %c0_i32 = arith.constant 0 : i32
    %c0_i32_0 = arith.constant 0 : i32
    return %arg0, %c0_i32 : i32, i32
  }
}

</mosaic_0001>

<bundles_post_ra>
// kernel: tpu_custom_call.1
= control target key start
LH: loop header
LB: loop body
LE: loop exit
PB: predicated region body
PF: predicated region fallthrough
CT: control target
= control target key end

     0   :  { %14 = vsyncpa [#allocation3], 0  ;;  %s2085_s0 = inlined_call_operand.vmem [shape: bf16[8,784], index: 0, kind: input, shape index: {}]   ;;  %s2086_s1 = inlined_call_operand.hbm [shape: bf16[784,256], index: 1, kind: input, shape index: {}]   ;;  %s2087_s2 = inlined_call_operand.vmem [shape: f32[1,256], index: 2, kind: input, shape index: {}]   ;;  %s2088_s3 = inlined_call_operand.hbm [shape: bf16[256,128], index: 3, kind: input, shape index: {}]   ;;  %s2089_s4 = inlined_call_operand.vmem [shape: f32[1,128], index: 4, kind: input, shape index: {}]   ;;  %s2090_s5 = inlined_call_operand.vmem [shape: bf16[128,64], index: 5, kind: input, shape index: {}]   ;;  %s2091_s6 = inlined_call_operand.vmem [shape: f32[1,64], index: 6, kind: input, shape index: {}]   ;;  %s2092_s7 = inlined_call_operand.vmem [shape: bf16[64,128], index: 7, kind: input, shape index: {}]   ;;  %s2093_s8 = inlined_call_operand.vmem [shape: f32[1,128], index: 8, kind: input, shape index: {}]   ;;  %s2094_s9 = inlined_call_operand.hbm [shape: f32[8,10], index: 9, kind: output, shape index: {}]  }
   0x1   :  { %15 = vsyncpa [#allocation6], 0 }
   0x2   :  { %16 = vsyncpa [#allocation4], 0  ;;  %s23_s11 = sshll.u32 %s2086_s1, 4  ;;  %s1929_s12 = smov [#allocation2]   ;;  %s24_s11 = int_to_ptr.hbm [resolvable:$true] %s23_s11 }
   0x3   :  { %s25_s13 = sshll.u32 %s1929_s12, 4  ;;  %s38_s16 = sshll.u32 %s2088_s3, 4  ;;  %s26_s13 = int_to_ptr.vmem [resolvable:$true] %s25_s13  ;;  %s39_s16 = int_to_ptr.hbm [resolvable:$true] %s38_s16 }
   0x4   :  { %s1930_s17 = smov 128   ;;  %s1931_s18 = smov 8  }
   0x5   :  { %31 = dma.hbm_to_vmem [thread:$0]  %s24_s11, 12544, %s26_s13, [#allocation3], %s1930_s17, %s1930_s17, %s1931_s18  }
   0x6   :  { %s1932_s19 = smov [#allocation5]   ;;  %s1933_s21 = smov 64  }
   0x7   :  { %s40_s20 = sshll.u32 %s1932_s19, 4  ;;  %s1934_s22 = smov 4   ;;  %s41_s20 = int_to_ptr.vmem [resolvable:$true] %s40_s20 }
   0x8   :  { %46 = dma.hbm_to_vmem [thread:$0]  %s39_s16, 2048, %s41_s20, [#allocation6], %s1933_s21, %s1933_s21, %s1934_s22  }
   0x9   :  { %1923 = dma.done.wait [#allocation3], 12544  }
   0xa   :  { %1924 = vsyncadd [#allocation3], 4294954752 }
   0xb   :  { %1925 = dma.done.wait [#allocation6], 2048  }
   0xc   :  { %1926 = vsyncadd [#allocation6], 4294965248  ;;  %v1262_v0 = vld [vmem:[#allocation2 + $0x70] sm:$0xf]  ;;  %v1726_v1 = vld [vmem:[#allocation2 + $0x74] sm:$0xf0] }
   0xd   :  { %v1390_v2 = vld [vmem:[#allocation2 + $0x170] sm:$0xf]  ;;  %v1263_v3 = vor.u32 %v1726_v1, %v1262_v0  ;;  %v1758_v4 = vld [vmem:[#allocation2 + $0x174] sm:$0xf0]  ;;  %v1254_v11 = vld [vmem:[#allocation2 + $0x60] sm:$0xf] }
   0xe   :  { %v1454_v5 = vld [vmem:[#allocation2 + $0x1f0] sm:$0xf]  ;;  %v1774_v6 = vld [vmem:[#allocation2 + $0x1f4] sm:$0xf0]  ;;  %v1391_v7 = vor.u32 %v1758_v4, %v1390_v2  ;;  %v1724_v13 = vld [vmem:[#allocation2 + $0x64] sm:$0xf0] }
   0xf   :  { %v1455_v8 = vor.u32 %v1774_v6, %v1454_v5  ;;  %v1326_v9 = vld [vmem:[#allocation2 + $0xf0] sm:$0xf]  ;;  %v1742_v10 = vld [vmem:[#allocation2 + $0xf4] sm:$0xf0]  ;;  %692 = vmatpush.bf16.msra.mxu0 %v1263_v3  ;;  %v1382_v14 = vld [vmem:[#allocation2 + $0x160] sm:$0xf]  ;;  %v1255_v16 = vor.u32 %v1724_v13, %v1254_v11 }
  0x10   :  { %v1327_v12 = vor.u32 %v1742_v10, %v1326_v9  ;;  %v1756_v15 = vld [vmem:[#allocation2 + $0x164] sm:$0xf0]  ;;  %718 = vmatpush.bf16.msra.mxu2 %v1391_v7  ;;  %v1446_v18 = vld [vmem:[#allocation2 + $0x1e0] sm:$0xf]  ;;  %v1246_v23 = vld [vmem:[#allocation2 + $0x50] sm:$0xf] }
  0x11   :  { %731 = vmatpush.bf16.msra.mxu3 %v1455_v8  ;;  %v1383_v17 = vor.u32 %v1756_v15, %v1382_v14  ;;  %v1772_v19 = vld [vmem:[#allocation2 + $0x1e4] sm:$0xf0]  ;;  %v1318_v20 = vld [vmem:[#allocation2 + $0xe0] sm:$0xf]  ;;  %v1722_v24 = vld [vmem:[#allocation2 + $0x54] sm:$0xf0] }
  0x12   :  { %705 = vmatpush.bf16.msra.mxu1 %v1327_v12  ;;  %v1447_v21 = vor.u32 %v1772_v19, %v1446_v18  ;;  %v1740_v22 = vld [vmem:[#allocation2 + $0xe4] sm:$0xf0]  ;;  %v1374_v26 = vld [vmem:[#allocation2 + $0x150] sm:$0xf]  ;;  %v1754_v27 = vld [vmem:[#allocation2 + $0x154] sm:$0xf0]  ;;  %v1247_v29 = vor.u32 %v1722_v24, %v1246_v23 }
  0x13   :  { %v1319_v25 = vor.u32 %v1740_v22, %v1318_v20  ;;  %v1438_v28 = vld [vmem:[#allocation2 + $0x1d0] sm:$0xf]  ;;  %693 = vmatpush.bf16.msra.mxu0 %v1255_v16  ;;  %v1770_v30 = vld [vmem:[#allocation2 + $0x1d4] sm:$0xf0]  ;;  %v1375_v33 = vor.u32 %v1754_v27, %v1374_v26  ;;  %v1238_v35 = vld [vmem:[#allocation2 + $0x40] sm:$0xf] }
  0x14   :  { %v1310_v31 = vld [vmem:[#allocation2 + $0xd0] sm:$0xf]  ;;  %v1738_v32 = vld [vmem:[#allocation2 + $0xd4] sm:$0xf0]  ;;  %719 = vmatpush.bf16.msra.mxu2 %v1383_v17  ;;  %v1439_v34 = vor.u32 %v1770_v30, %v1438_v28  ;;  %v1720_v36 = vld [vmem:[#allocation2 + $0x44] sm:$0xf0] }
  0x15   :  { %732 = vmatpush.bf16.msra.mxu3 %v1447_v21  ;;  %v1366_v37 = vld [vmem:[#allocation2 + $0x140] sm:$0xf]  ;;  %v1311_v38 = vor.u32 %v1738_v32, %v1310_v31  ;;  %v1752_v39 = vld [vmem:[#allocation2 + $0x144] sm:$0xf0]  ;;  %v1239_v44 = vor.u32 %v1720_v36, %v1238_v35  ;;  %v1230_v47 = vld [vmem:[#allocation2 + $0x30] sm:$0xf] }
  0x16   :  { %706 = vmatpush.bf16.msra.mxu1 %v1319_v25  ;;  %v1430_v40 = vld [vmem:[#allocation2 + $0x1c0] sm:$0xf]  ;;  %v1768_v41 = vld [vmem:[#allocation2 + $0x1c4] sm:$0xf0]  ;;  %v1367_v45 = vor.u32 %v1752_v39, %v1366_v37  ;;  %v1718_v48 = vld [vmem:[#allocation2 + $0x34] sm:$0xf0] }
  0x17   :  { %v1302_v42 = vld [vmem:[#allocation2 + $0xc0] sm:$0xf]  ;;  %v1736_v43 = vld [vmem:[#allocation2 + $0xc4] sm:$0xf0]  ;;  %694 = vmatpush.bf16.msra.mxu0 %v1247_v29  ;;  %v1431_v46 = vor.u32 %v1768_v41, %v1430_v40  ;;  %v1358_v49 = vld [vmem:[#allocation2 + $0x130] sm:$0xf]  ;;  %v1231_v56 = vor.u32 %v1718_v48, %v1230_v47 }
  0x18   :  { %720 = vmatpush.bf16.msra.mxu2 %v1375_v33  ;;  %v1303_v50 = vor.u32 %v1736_v43, %v1302_v42  ;;  %v1750_v51 = vld [vmem:[#allocation2 + $0x134] sm:$0xf0]  ;;  %v1422_v52 = vld [vmem:[#allocation2 + $0x1b0] sm:$0xf]  ;;  %v1222_v59 = vld [vmem:[#allocation2 + $0x20] sm:$0xf] }
  0x19   :  { %733 = vmatpush.bf16.msra.mxu3 %v1439_v34  ;;  %v1766_v53 = vld [vmem:[#allocation2 + $0x1b4] sm:$0xf0]  ;;  %v1294_v54 = vld [vmem:[#allocation2 + $0xb0] sm:$0xf]  ;;  %v1359_v57 = vor.u32 %v1750_v51, %v1358_v49  ;;  %v1716_v60 = vld [vmem:[#allocation2 + $0x24] sm:$0xf0] }
  0x1a   :  { %707 = vmatpush.bf16.msra.mxu1 %v1311_v38  ;;  %v1734_v55 = vld [vmem:[#allocation2 + $0xb4] sm:$0xf0]  ;;  %v1423_v58 = vor.u32 %v1766_v53, %v1422_v52  ;;  %v1350_v61 = vld [vmem:[#allocation2 + $0x120] sm:$0xf]  ;;  %v1748_v63 = vld [vmem:[#allocation2 + $0x124] sm:$0xf0]  ;;  %v1223_v4 = vor.u32 %v1716_v60, %v1222_v59 }
  0x1b   :  { %695 = vmatpush.bf16.msra.mxu0 %v1239_v44  ;;  %v1295_v62 = vor.u32 %v1734_v55, %v1294_v54  ;;  %v1414_v0 = vld [vmem:[#allocation2 + $0x1a0] sm:$0xf]  ;;  %v1764_v1 = vld [vmem:[#allocation2 + $0x1a4] sm:$0xf0]  ;;  %v1351_v5 = vor.u32 %v1748_v63, %v1350_v61  ;;  %v1214_v7 = vld [vmem:[#allocation2 + $0x10] sm:$0xf] }
  0x1c   :  { %721 = vmatpush.bf16.msra.mxu2 %v1367_v45  ;;  %v1286_v2 = vld [vmem:[#allocation2 + $0xa0] sm:$0xf]  ;;  %v1732_v3 = vld [vmem:[#allocation2 + $0xa4] sm:$0xf0]  ;;  %v1415_v6 = vor.u32 %v1764_v1, %v1414_v0  ;;  %v1714_v8 = vld [vmem:[#allocation2 + $0x14] sm:$0xf0] }
  0x1d   :  { %734 = vmatpush.bf16.msra.mxu3 %v1431_v46  ;;  %v1342_v9 = vld [vmem:[#allocation2 + $0x110] sm:$0xf]  ;;  %v1287_v10 = vor.u32 %v1732_v3, %v1286_v2  ;;  %v1746_v11 = vld [vmem:[#allocation2 + $0x114] sm:$0xf0]  ;;  %v1206_v16 = vld [vmem:[#allocation2] sm:$0xf]  ;;  %v1215_v17 = vor.u32 %v1714_v8, %v1214_v7 }
  0x1e   :  { %708 = vmatpush.bf16.msra.mxu1 %v1303_v50  ;;  %v1406_v12 = vld [vmem:[#allocation2 + $0x190] sm:$0xf]  ;;  %v1762_v13 = vld [vmem:[#allocation2 + $0x194] sm:$0xf0]  ;;  %v1712_v18 = vld [vmem:[#allocation2 + $0x4] sm:$0xf0]  ;;  %v1343_v21 = vor.u32 %v1746_v11, %v1342_v9 }
  0x1f   :  { %696 = vmatpush.bf16.msra.mxu0 %v1231_v56  ;;  %v1278_v14 = vld [vmem:[#allocation2 + $0x90] sm:$0xf]  ;;  %v1730_v15 = vld [vmem:[#allocation2 + $0x94] sm:$0xf0]  ;;  %v1334_v19 = vld [vmem:[#allocation2 + $0x100] sm:$0xf]  ;;  %v1407_v22 = vor.u32 %v1762_v13, %v1406_v12  ;;  %v1207_v33 = vor.u32 %v1712_v18, %v1206_v16 }
  0x20   :  { %722 = vmatpush.bf16.msra.mxu2 %v1359_v57  ;;  %v1744_v20 = vld [vmem:[#allocation2 + $0x104] sm:$0xf0]  ;;  %v1398_v23 = vld [vmem:[#allocation2 + $0x180] sm:$0xf]  ;;  %v1279_v26 = vor.u32 %v1730_v15, %v1278_v14  ;;  %v1518_v27 = vld [vmem:[#allocation2 + $0x270] sm:$0xf] }
  0x21   :  { %735 = vmatpush.bf16.msra.mxu3 %v1423_v58  ;;  %v1760_v24 = vld [vmem:[#allocation2 + $0x184] sm:$0xf0]  ;;  %v1790_v28 = vld [vmem:[#allocation2 + $0x274] sm:$0xf0]  ;;  %v1725_v29 = vld [vmem:[#allocation2 + $0x74] sm:$0xf]  ;;  %v1335_v37 = vor.u32 %v1744_v20, %v1334_v19 }
  0x22   :  { %709 = vmatpush.bf16.msra.mxu1 %v1295_v62  ;;  %v67_v25 = vld [vmem:[%s2085_s0 + $0x8] sm:$0xff]  ;;  %v1264_v30 = vld [vmem:[#allocation2 + $0x78] sm:$0xf0]  ;;  %v1270_v31 = vld [vmem:[#allocation2 + $0x80] sm:$0xf]  ;;  %v1399_v38 = vor.u32 %v1760_v24, %v1398_v23  ;;  %v1519_v42 = vor.u32 %v1790_v28, %v1518_v27  ;;  %vm688_vm0 = vcmask 130048  }
  0x23   :  { %697 = vmatpush.bf16.msra.mxu0 %v1223_v4  ;;  %v1728_v32 = vld [vmem:[#allocation2 + $0x84] sm:$0xf0]  ;;  %v180_v34 = vunpack.c.l.b16 %v67_v25  ;;  %v1590_v35 = vld [vmem:[#allocation2 + $0x300] sm:$0xf]  ;;  %v1582_v39 = vld [vmem:[#allocation2 + $0x2f0] sm:$0xf]  ;;  %v1267_v43 = vor.u32 %v1725_v29, %v1264_v30  ;;  %v181_v53 = vunpack.c.h.b16 %v67_v25 }
  0x24   :  { %723 = vmatpush.bf16.msra.mxu2 %v1351_v5  ;;  %v1808_v36 = vld [vmem:[#allocation2 + $0x304] sm:$0xf0]  ;;  %v1806_v40 = vld [vmem:[#allocation2 + $0x2f4] sm:$0xf0]  ;;  %v1741_v41 = vld [vmem:[#allocation2 + $0xf4] sm:$0xf]  ;;  %v1271_v44 = vor.u32 %v1728_v32, %v1270_v31 }
  0x25   :  { %736 = vmatpush.bf16.msra.mxu3 %v1415_v6  ;;  %v1328_v45 = vld [vmem:[#allocation2 + $0xf8] sm:$0xf0]  ;;  %v1510_v46 = vld [vmem:[#allocation2 + $0x260] sm:$0xf]  ;;  %v1591_v48 = vor.u32 %v1808_v36, %v1590_v35  ;;  %v1788_v49 = vld [vmem:[#allocation2 + $0x264] sm:$0xf0]  ;;  %v1998_v55 = vpack.c.b16 %v180_v34, %v180_v34  ;;  %v1583_v56 = vor.u32 %v1806_v40, %v1582_v39  ;;  %v2002_v5 = vpack.c.b16 %v181_v53, %v181_v53 }
  0x26   :  { %710 = vmatpush.bf16.msra.mxu1 %v1287_v10  ;;  %v66_v47 = vld [vmem:[%s2085_s0] sm:$0xff]  ;;  %v1256_v51 = vld [vmem:[#allocation2 + $0x68] sm:$0xf0]  ;;  %v1331_v57 = vor.u32 %v1741_v41, %v1328_v45  ;;  %v1804_v59 = vld [vmem:[#allocation2 + $0x2e4] sm:$0xf0]  ;;  %v1511_v61 = vor.u32 %v1788_v49, %v1510_v46  ;;  %vm1157_vm1 = vcmask 523264  }
  0x27   :  { %698 = vmatpush.bf16.msra.mxu0 %v1215_v17  ;;  %v1723_v50 = vld [vmem:[#allocation2 + $0x64] sm:$0xf]  ;;  %v178_v52 = vunpack.c.l.b16 %v66_v47  ;;  %v179_v54 = vunpack.c.h.b16 %v66_v47  ;;  %v1574_v58 = vld [vmem:[#allocation2 + $0x2e0] sm:$0xf]  ;;  %v1320_v0 = vld [vmem:[#allocation2 + $0xe8] sm:$0xf0] }
  0x28   :  { %724 = vmatpush.bf16.msra.mxu2 %v1343_v21  ;;  %v1259_v62 = vor.u32 %v1723_v50, %v1256_v51  ;;  %v1739_v63 = vld [vmem:[#allocation2 + $0xe4] sm:$0xf]  ;;  %v1502_v1 = vld [vmem:[#allocation2 + $0x250] sm:$0xf]  ;;  %v1786_v2 = vld [vmem:[#allocation2 + $0x254] sm:$0xf0]  ;;  %v1575_v7 = vor.u32 %v1804_v59, %v1574_v58 }
  0x29   :  { %737 = vmatpush.bf16.msra.mxu3 %v1407_v22  ;;  %v2000_v60 = vpack.c.b16 %v178_v52, %v178_v52  ;;  %v1721_v3 = vld [vmem:[#allocation2 + $0x54] sm:$0xf]  ;;  %v1248_v4 = vld [vmem:[#allocation2 + $0x58] sm:$0xf0]  ;;  %v2004_v6 = vpack.c.b16 %v179_v54, %v179_v54  ;;  %v1323_v8 = vor.u32 %v1739_v63, %v1320_v0  ;;  %v1566_v9 = vld [vmem:[#allocation2 + $0x2d0] sm:$0xf]  ;;  %v1503_v11 = vor.u32 %v1786_v2, %v1502_v1 }
  0x2a   :  { %711 = vmatpush.bf16.msra.mxu1 %v1279_v26  ;;  %v1802_v10 = vld [vmem:[#allocation2 + $0x2d4] sm:$0xf0]  ;;  %v1251_v12 = vor.u32 %v1721_v3, %v1248_v4  ;;  %v1737_v13 = vld [vmem:[#allocation2 + $0xd4] sm:$0xf]  ;;  %v1312_v14 = vld [vmem:[#allocation2 + $0xd8] sm:$0xf0] }
  0x2b   :  { %699 = vmatpush.bf16.msra.mxu0 %v1207_v33  ;;  %v1494_v15 = vld [vmem:[#allocation2 + $0x240] sm:$0xf]  ;;  %v1784_v16 = vld [vmem:[#allocation2 + $0x244] sm:$0xf0]  ;;  %v1719_v17 = vld [vmem:[#allocation2 + $0x44] sm:$0xf]  ;;  %v1567_v19 = vor.u32 %v1802_v10, %v1566_v9  ;;  %v1315_v20 = vor.u32 %v1737_v13, %v1312_v14 }
  0x2c   :  { %725 = vmatpush.bf16.msra.mxu2 %v1335_v37  ;;  %v1240_v18 = vld [vmem:[#allocation2 + $0x48] sm:$0xf0]  ;;  %v1558_v21 = vld [vmem:[#allocation2 + $0x2c0] sm:$0xf]  ;;  %v1800_v22 = vld [vmem:[#allocation2 + $0x2c4] sm:$0xf0]  ;;  %v1495_v24 = vor.u32 %v1784_v16, %v1494_v15 }
  0x2d   :  { %738 = vmatpush.bf16.msra.mxu3 %v1399_v38  ;;  %v1735_v23 = vld [vmem:[#allocation2 + $0xc4] sm:$0xf]  ;;  %v1243_v25 = vor.u32 %v1719_v17, %v1240_v18  ;;  %v1304_v26 = vld [vmem:[#allocation2 + $0xc8] sm:$0xf0]  ;;  %v1486_v27 = vld [vmem:[#allocation2 + $0x230] sm:$0xf]  ;;  %v1559_v32 = vor.u32 %v1800_v22, %v1558_v21 }
  0x2e   :  { %712 = vmatpush.bf16.msra.mxu1 %v1271_v44  ;;  %700 = vmatmul.bf16.vlgmr.msra.gmra.mxu0 %v2000_v60  ;;  %v1782_v28 = vld [vmem:[#allocation2 + $0x234] sm:$0xf0]  ;;  %v1717_v29 = vld [vmem:[#allocation2 + $0x34] sm:$0xf]  ;;  %v1232_v30 = vld [vmem:[#allocation2 + $0x38] sm:$0xf0]  ;;  %v1307_v34 = vor.u32 %v1735_v23, %v1304_v26 }
  0x2f   :  { %744 = vmatpush.bf16.msrb.mxu0 %v1519_v42  ;;  %726 = vmatmul.bf16.vlgmr.msra.gmra.mxu2 %v1998_v55  ;;  %v69_v31 = vld [vmem:[%s2085_s0 + $0x18] sm:$0xf]  ;;  %v1550_v35 = vld [vmem:[#allocation2 + $0x2b0] sm:$0xf]  ;;  %v1487_v37 = vor.u32 %v1782_v28, %v1486_v27  ;;  %v1235_v38 = vor.u32 %v1717_v29, %v1232_v30  ;;  %v1733_v39 = vld [vmem:[#allocation2 + $0xb4] sm:$0xf] }
  0x30   :  { %777 = vmatpush.bf16.msrb.mxu2 %v1591_v48  ;;  %739 = vmatmul.bf16.vlgmr.msra.gmra.mxu3 %v2002_v5  ;;  %v184_v33 = vunpack.c.l.b16 %v69_v31  ;;  %v1798_v36 = vld [vmem:[#allocation2 + $0x2b4] sm:$0xf0]  ;;  %v1296_v40 = vld [vmem:[#allocation2 + $0xb8] sm:$0xf0]  ;;  %v1478_v41 = vld [vmem:[#allocation2 + $0x220] sm:$0xf] }
  0x31   :  { %783 = vmatpush.bf16.msrb.mxu3 %v1267_v43  ;;  %713 = vmatmul.bf16.vlgmr.msra.gmra.mxu1 %v2004_v6  ;;  %v1780_v42 = vld [vmem:[#allocation2 + $0x224] sm:$0xf0]  ;;  %v1715_v43 = vld [vmem:[#allocation2 + $0x24] sm:$0xf]  ;;  %v1224_v44 = vld [vmem:[#allocation2 + $0x28] sm:$0xf0]  ;;  %v1551_v45 = vor.u32 %v1798_v36, %v1550_v35  ;;  %v1299_v47 = vor.u32 %v1733_v39, %v1296_v40 }
  0x32   :  { %757 = vmatpush.bf16.msrb.mxu1 %v1583_v56  ;;  %v2013_v46 = vpack.c.b16 %v184_v33, %v184_v33  ;;  %v1542_v48 = vld [vmem:[#allocation2 + $0x2a0] sm:$0xf]  ;;  %v1796_v49 = vld [vmem:[#allocation2 + $0x2a4] sm:$0xf0]  ;;  %v1479_v50 = vor.u32 %v1780_v42, %v1478_v41  ;;  %v1227_v51 = vor.u32 %v1715_v43, %v1224_v44  ;;  %v1731_v52 = vld [vmem:[#allocation2 + $0xa4] sm:$0xf] }
  0x33   :  { %745 = vmatpush.bf16.msrb.mxu0 %v1511_v61  ;;  %v1288_v53 = vld [vmem:[#allocation2 + $0xa8] sm:$0xf0]  ;;  %v1470_v54 = vld [vmem:[#allocation2 + $0x210] sm:$0xf]  ;;  %v1778_v56 = vld [vmem:[#allocation2 + $0x214] sm:$0xf0]  ;;  %v1543_v59 = vor.u32 %v1796_v49, %v1542_v48 }
  0x34   :  { %796 = vmatpush.bf16.msra.mxu2 %v1331_v57  ;;  %v1713_v57 = vld [vmem:[#allocation2 + $0x14] sm:$0xf]  ;;  %v1216_v58 = vld [vmem:[#allocation2 + $0x18] sm:$0xf0]  ;;  %v1534_v61 = vld [vmem:[#allocation2 + $0x290] sm:$0xf]  ;;  %v1471_v2 = vor.u32 %v1778_v56, %v1470_v54 }
  0x35   :  { %784 = vmatpush.bf16.msrb.mxu3 %v1259_v62  ;;  %v1291_v62 = vor.u32 %v1731_v52, %v1288_v53  ;;  %v1794_v63 = vld [vmem:[#allocation2 + $0x294] sm:$0xf0]  ;;  %v1729_v0 = vld [vmem:[#allocation2 + $0x94] sm:$0xf]  ;;  %v1280_v1 = vld [vmem:[#allocation2 + $0x98] sm:$0xf0]  ;;  %v1219_v3 = vor.u32 %v1713_v57, %v1216_v58 }
  0x36   :  { %758 = vmatpush.bf16.msrb.mxu1 %v1575_v7  ;;  %v1462_v4 = vld [vmem:[#allocation2 + $0x200] sm:$0xf]  ;;  %v1776_v7 = vld [vmem:[#allocation2 + $0x204] sm:$0xf0]  ;;  %v1711_v9 = vld [vmem:[#allocation2 + $0x4] sm:$0xf]  ;;  %v1283_v16 = vor.u32 %v1729_v0, %v1280_v1 }
  0x37   :  { %746 = vmatpush.bf16.msrb.mxu0 %v1503_v11  ;;  %v1208_v10 = vld [vmem:[#allocation2 + $0x8] sm:$0xf0]  ;;  %v1757_v11 = vld [vmem:[#allocation2 + $0x174] sm:$0xf]  ;;  %v1392_v13 = vld [vmem:[#allocation2 + $0x178] sm:$0xf0] }
  0x38   :  { %797 = vmatpush.bf16.msra.mxu2 %v1323_v8  ;;  %v68_v8 = vld [vmem:[%s2085_s0 + $0x10] sm:$0xff]  ;;  %v1520_v15 = vld [vmem:[#allocation2 + $0x278] sm:$0xf0]  ;;  %v1526_v17 = vld [vmem:[#allocation2 + $0x280] sm:$0xf]  ;;  %v1211_v21 = vor.u32 %v1711_v9, %v1208_v10  ;;  %s1193_s13 = sshll.u32 %s2094_s9, 4  ;;  %s1194_s13 = int_to_ptr.hbm [resolvable:$true] %s1193_s13 }
  0x39   :  { %785 = vmatpush.bf16.msrb.mxu3 %v1251_v12  ;;  %v1535_v12 = vor.u32 %v1794_v63, %v1534_v61  ;;  %v1789_v14 = vld [vmem:[#allocation2 + $0x274] sm:$0xf]  ;;  %v1792_v18 = vld [vmem:[#allocation2 + $0x284] sm:$0xf0]  ;;  %v1727_v22 = vld [vmem:[#allocation2 + $0x84] sm:$0xf]  ;;  %v183_v30 = vunpack.c.h.b16 %v68_v8 }
  0x3a   :  { %759 = vmatpush.bf16.msrb.mxu1 %v1567_v19  ;;  %v182_v19 = vunpack.c.l.b16 %v68_v8  ;;  %v1272_v23 = vld [vmem:[#allocation2 + $0x88] sm:$0xf0]  ;;  %v1523_v26 = vor.u32 %v1789_v14, %v1520_v15  ;;  %v1456_v27 = vld [vmem:[#allocation2 + $0x1f8] sm:$0xf0]  ;;  %v1805_v28 = vld [vmem:[#allocation2 + $0x2f4] sm:$0xf]  ;;  %v1527_v31 = vor.u32 %v1792_v18, %v1526_v17 }
  0x3b   :  { %747 = vmatpush.bf16.msrb.mxu0 %v1495_v24  ;;  %v1773_v24 = vld [vmem:[#allocation2 + $0x1f4] sm:$0xf]  ;;  %v1584_v29 = vld [vmem:[#allocation2 + $0x2f8] sm:$0xf0]  ;;  %v1384_v33 = vld [vmem:[#allocation2 + $0x168] sm:$0xf0]  ;;  %v1275_v35 = vor.u32 %v1727_v22, %v1272_v23  ;;  %v2022_v41 = vpack.c.b16 %v183_v30, %v183_v30 }
  0x3c   :  { %798 = vmatpush.bf16.msra.mxu2 %v1315_v20  ;;  %v1463_v20 = vor.u32 %v1776_v7, %v1462_v4  ;;  %v1787_v36 = vld [vmem:[#allocation2 + $0x264] sm:$0xf]  ;;  %v1587_v39 = vor.u32 %v1805_v28, %v1584_v29  ;;  %v1448_v43 = vld [vmem:[#allocation2 + $0x1e8] sm:$0xf0]  ;;  %v1753_v48 = vld [vmem:[#allocation2 + $0x154] sm:$0xf] }
  0x3d   :  { %786 = vmatpush.bf16.msrb.mxu3 %v1243_v25  ;;  %v1395_v25 = vor.u32 %v1757_v11, %v1392_v13  ;;  %v1771_v40 = vld [vmem:[#allocation2 + $0x1e4] sm:$0xf]  ;;  %v1376_v49 = vld [vmem:[#allocation2 + $0x158] sm:$0xf0]  ;;  %v1769_v54 = vld [vmem:[#allocation2 + $0x1d4] sm:$0xf] }
  0x3e   :  { %760 = vmatpush.bf16.msrb.mxu1 %v1559_v32  ;;  %v1755_v32 = vld [vmem:[#allocation2 + $0x164] sm:$0xf]  ;;  %v1451_v52 = vor.u32 %v1771_v40, %v1448_v43  ;;  %v1440_v56 = vld [vmem:[#allocation2 + $0x1d8] sm:$0xf0]  ;;  %v1801_v57 = vld [vmem:[#allocation2 + $0x2d4] sm:$0xf]  ;;  %v1379_v58 = vor.u32 %v1753_v48, %v1376_v49 }
  0x3f   :  { %748 = vmatpush.bf16.msrb.mxu0 %v1487_v37  ;;  %1596 = vmatmul.msk.bf16.vlgmr.msrb.gmra.mxu2 %vm688_vm0, %v2013_v46  ;;  %v1512_v37 = vld [vmem:[#allocation2 + $0x268] sm:$0xf0]  ;;  %v1387_v42 = vor.u32 %v1755_v32, %v1384_v33  ;;  %v1803_v44 = vld [vmem:[#allocation2 + $0x2e4] sm:$0xf]  ;;  %v1360_v13 = vld [vmem:[#allocation2 + $0x138] sm:$0xf0] }
  0x40   :  { %799 = vmatpush.bf16.msra.mxu2 %v1307_v34  ;;  %v2020_v34 = vpack.c.b16 %v182_v19, %v182_v19  ;;  %v1751_v61 = vld [vmem:[#allocation2 + $0x144] sm:$0xf]  ;;  %v1368_v63 = vld [vmem:[#allocation2 + $0x148] sm:$0xf0]  ;;  %v1781_v14 = vld [vmem:[#allocation2 + $0x234] sm:$0xf] }
  0x41   :  { %787 = vmatpush.bf16.msrb.mxu3 %v1235_v38  ;;  %v1459_v38 = vor.u32 %v1773_v24, %v1456_v27  ;;  %v1783_v0 = vld [vmem:[#allocation2 + $0x244] sm:$0xf]  ;;  %v1496_v1 = vld [vmem:[#allocation2 + $0x248] sm:$0xf0]  ;;  %v1371_v7 = vor.u32 %v1751_v61, %v1368_v63  ;;  %v1424_v18 = vld [vmem:[#allocation2 + $0x1b8] sm:$0xf0] }
  0x42   :  { %761 = vmatpush.bf16.msrb.mxu1 %v1551_v45  ;;  %v1576_v45 = vld [vmem:[#allocation2 + $0x2e8] sm:$0xf0]  ;;  %v1767_v4 = vld [vmem:[#allocation2 + $0x1c4] sm:$0xf]  ;;  %v1499_v11 = vor.u32 %v1783_v0, %v1496_v1  ;;  %v1797_v19 = vld [vmem:[#allocation2 + $0x2b4] sm:$0xf] }
  0x43   :  { %749 = vmatpush.bf16.msrb.mxu0 %v1479_v50  ;;  %v1785_v50 = vld [vmem:[#allocation2 + $0x254] sm:$0xf]  ;;  %v1579_v53 = vor.u32 %v1803_v44, %v1576_v45  ;;  %v1432_v8 = vld [vmem:[#allocation2 + $0x1c8] sm:$0xf0]  ;;  %v1799_v9 = vld [vmem:[#allocation2 + $0x2c4] sm:$0xf] }
  0x44   :  { %800 = vmatpush.bf16.msra.mxu2 %v1299_v47  ;;  %v1515_v47 = vor.u32 %v1787_v36, %v1512_v37  ;;  %v1560_v10 = vld [vmem:[#allocation2 + $0x2c8] sm:$0xf0]  ;;  %v1435_v15 = vor.u32 %v1767_v4, %v1432_v8  ;;  %v1747_v22 = vld [vmem:[#allocation2 + $0x124] sm:$0xf]  ;;  %v1344_v36 = vld [vmem:[#allocation2 + $0x118] sm:$0xf0] }
  0x45   :  { %788 = vmatpush.bf16.msrb.mxu3 %v1227_v51  ;;  %v1504_v51 = vld [vmem:[#allocation2 + $0x258] sm:$0xf0]  ;;  %v1352_v23 = vld [vmem:[#allocation2 + $0x128] sm:$0xf0]  ;;  %v1779_v24 = vld [vmem:[#allocation2 + $0x224] sm:$0xf] }
  0x46   :  { %762 = vmatpush.bf16.msrb.mxu1 %v1543_v59  ;;  %v1568_v59 = vld [vmem:[#allocation2 + $0x2d8] sm:$0xf0]  ;;  %v1763_v28 = vld [vmem:[#allocation2 + $0x1a4] sm:$0xf]  ;;  %v1355_v29 = vor.u32 %v1747_v22, %v1352_v23  ;;  %v1416_v30 = vld [vmem:[#allocation2 + $0x1a8] sm:$0xf0] }
  0x47   :  { %750 = vmatpush.bf16.msrb.mxu0 %v1471_v2  ;;  %v1443_v2 = vor.u32 %v1769_v54, %v1440_v56  ;;  %v1544_v32 = vld [vmem:[#allocation2 + $0x2a8] sm:$0xf0]  ;;  %v1777_v37 = vld [vmem:[#allocation2 + $0x214] sm:$0xf]  ;;  %v1408_v44 = vld [vmem:[#allocation2 + $0x198] sm:$0xf0] }
  0x48   :  { %801 = vmatpush.bf16.msra.mxu2 %v1291_v62  ;;  %v1507_v62 = vor.u32 %v1785_v50, %v1504_v51  ;;  %v1793_v45 = vld [vmem:[#allocation2 + $0x294] sm:$0xf]  ;;  %v1743_v49 = vld [vmem:[#allocation2 + $0x104] sm:$0xf]  ;;  %v1336_v50 = vld [vmem:[#allocation2 + $0x108] sm:$0xf0] }
  0x49   :  { %789 = vmatpush.bf16.msrb.mxu3 %v1219_v3  ;;  %v1571_v3 = vor.u32 %v1801_v57, %v1568_v59  ;;  %v1775_v51 = vld [vmem:[#allocation2 + $0x204] sm:$0xf]  ;;  %v1592_v54 = vld [vmem:[#allocation2 + $0x308] sm:$0xf0]  ;;  %v1814_v8 = vld [vmem:[#allocation5 + $0x28] sm:$0xff]  ;;  %vm1184_vm2 = vcmask 80896  }
  0x4a   :  { %763 = vmatpush.bf16.msrb.mxu1 %v1535_v12  ;;  %v1749_v12 = vld [vmem:[#allocation2 + $0x134] sm:$0xf]  ;;  %v1759_v59 = vld [vmem:[#allocation2 + $0x184] sm:$0xf]  ;;  %v1400_v61 = vld [vmem:[#allocation2 + $0x188] sm:$0xf0] }
  0x4b   :  { %751 = vmatpush.bf16.msrb.mxu0 %v1463_v20  ;;  %v1363_v17 = vor.u32 %v1749_v12, %v1360_v13  ;;  %v1552_v20 = vld [vmem:[#allocation2 + $0x2b8] sm:$0xf0]  ;;  %v1791_v63 = vld [vmem:[#allocation2 + $0x284] sm:$0xf]  ;;  %v1528_v0 = vld [vmem:[#allocation2 + $0x288] sm:$0xf0] }
  0x4c   :  { %802 = vmatpush.bf16.msra.mxu2 %v1283_v16  ;;  %v1765_v16 = vld [vmem:[#allocation2 + $0x1b4] sm:$0xf]  ;;  %v1555_v27 = vor.u32 %v1797_v19, %v1552_v20  ;;  %v1816_v4 = vld [vmem:[#allocation5 + $0x38] sm:$0xff]  ;;  %v1822_v23 = vld [vmem:[#allocation5 + $0x68] sm:$0xff] }
  0x4d   :  { %790 = vmatpush.bf16.msrb.mxu3 %v1211_v21 }
  0x4e   :  { %764 = vmatpush.bf16.msrb.mxu1 %v1527_v31  ;;  %752 = vmatmul.bf16.vlgmr.msrb.gmra.mxu0 %v2020_v34  ;;  %v1795_v31 = vld [vmem:[#allocation2 + $0x2a4] sm:$0xf] }
  0x4f   :  { %809 = vmatpush.bf16.msra.mxu0 %v1395_v25  ;;  %v1480_v25 = vld [vmem:[#allocation2 + $0x228] sm:$0xf0]  ;;  %v1547_v40 = vor.u32 %v1795_v31, %v1544_v32 }
  0x50   :  { %803 = vmatpush.bf16.msra.mxu2 %v1275_v35  ;;  %791 = vmatmul.bf16.vlgmr.msrb.gmra.mxu3 %v2000_v60  ;;  %v1563_v60 = vor.u32 %v1799_v9, %v1560_v10  ;;  %v1483_v33 = vor.u32 %v1779_v24, %v1480_v25  ;;  %v1745_v35 = vld [vmem:[#allocation2 + $0x114] sm:$0xf]  ;;  %v1812_v10 = vld [vmem:[#allocation5 + $0x18] sm:$0xff] }
  0x51   :  { %835 = vmatpush.bf16.msra.mxu3 %v1523_v26  ;;  %765 = vmatmul.bf16.vlgmr.msrb.gmra.mxu1 %v2022_v41  ;;  %v1427_v26 = vor.u32 %v1765_v16, %v1424_v18  ;;  %v1347_v43 = vor.u32 %v1745_v35, %v1344_v36  ;;  %v1813_v9 = vld [vmem:[#allocation5 + $0x20] sm:$0xff]  ;;  %v1820_v31 = vld [vmem:[#allocation5 + $0x58] sm:$0xff]  ;;  %v1819_v36 = vld [vmem:[#allocation5 + $0x50] sm:$0xff] }
  0x52   :  { %822 = vmatpush.bf16.msra.mxu1 %v1459_v38  ;;  %v1472_v38 = vld [vmem:[#allocation2 + $0x218] sm:$0xf0] }
  0x53   :  { %810 = vmatpush.bf16.msra.mxu0 %v1387_v42  ;;  %804 = vmatmul.bf16.vlgmr.msra.gmra.mxu2 %v2004_v6  ;;  %v1488_v6 = vld [vmem:[#allocation2 + $0x238] sm:$0xf0]  ;;  %v1761_v42 = vld [vmem:[#allocation2 + $0x194] sm:$0xf]  ;;  %v1475_v48 = vor.u32 %v1777_v37, %v1472_v38 }
  0x54   :  { %848 = vmatpush.bf16.msrb.mxu2 %v1587_v39  ;;  %v1491_v21 = vor.u32 %v1781_v14, %v1488_v6  ;;  %v1419_v39 = vor.u32 %v1763_v28, %v1416_v30  ;;  %v1411_v56 = vor.u32 %v1761_v42, %v1408_v44  ;;  %v1824_v6 = vld [vmem:[#allocation5 + $0x78] sm:$0xff]  ;;  %v1818_v42 = vld [vmem:[#allocation5 + $0x48] sm:$0xff] }
  0x55   :  { %836 = vmatpush.bf16.msra.mxu3 %v1515_v47  ;;  %v1536_v47 = vld [vmem:[#allocation2 + $0x298] sm:$0xf0] }
  0x56   :  { %823 = vmatpush.bf16.msra.mxu1 %v1451_v52  ;;  %v1464_v52 = vld [vmem:[#allocation2 + $0x208] sm:$0xf0]  ;;  %v1539_v57 = vor.u32 %v1793_v45, %v1536_v47 }
  0x57   :  { %811 = vmatpush.bf16.msra.mxu0 %v1379_v58  ;;  %v1339_v58 = vor.u32 %v1743_v49, %v1336_v50 }
  0x58   :  { %849 = vmatpush.bf16.msrb.mxu2 %v1579_v53  ;;  %v1807_v53 = vld [vmem:[#allocation2 + $0x304] sm:$0xf] }
  0x59   :  { %837 = vmatpush.bf16.msra.mxu3 %v1507_v62  ;;  %v1467_v62 = vor.u32 %v1775_v51, %v1464_v52  ;;  %v1595_v1 = vor.u32 %v1807_v53, %v1592_v54 }
  0x5a   :  { %824 = vmatpush.bf16.msra.mxu1 %v1443_v2  ;;  %v1403_v2 = vor.u32 %v1759_v59, %v1400_v61 }
  0x5b   :  { %812 = vmatpush.bf16.msra.mxu0 %v1371_v7  ;;  %v1815_v7 = vld [vmem:[#allocation5 + $0x30] sm:$0xff] }
  0x5c   :  { %850 = vmatpush.bf16.msrb.mxu2 %v1571_v3  ;;  %v1531_v3 = vor.u32 %v1791_v63, %v1528_v0 }
  0x5d   :  { %838 = vmatpush.bf16.msra.mxu3 %v1499_v11 }
  0x5e   :  { %825 = vmatpush.bf16.msra.mxu1 %v1435_v15 }
  0x5f   :  { %813 = vmatpush.bf16.msra.mxu0 %v1363_v17  ;;  %v1823_v17 = vld [vmem:[#allocation5 + $0x70] sm:$0xff] }
  0x60   :  { %851 = vmatpush.bf16.msrb.mxu2 %v1563_v60 }
  0x61   :  { %839 = vmatpush.bf16.msra.mxu3 %v1491_v21 }
  0x62   :  { %826 = vmatpush.bf16.msra.mxu1 %v1427_v26  ;;  %v1821_v26 = vld [vmem:[#allocation5 + $0x60] sm:$0xff] }
  0x63   :  { %814 = vmatpush.bf16.msra.mxu0 %v1355_v29 }
  0x64   :  { %852 = vmatpush.bf16.msrb.mxu2 %v1555_v27 }
  0x65   :  { %840 = vmatpush.bf16.msra.mxu3 %v1483_v33 }
  0x66   :  { %827 = vmatpush.bf16.msra.mxu1 %v1419_v39 }
  0x67   :  { %815 = vmatpush.bf16.msra.mxu0 %v1347_v43  ;;  %v1817_v43 = vld [vmem:[#allocation5 + $0x40] sm:$0xff] }
  0x68   :  { %853 = vmatpush.bf16.msrb.mxu2 %v1547_v40 }
  0x69   :  { %841 = vmatpush.bf16.msra.mxu3 %v1475_v48 }
  0x6a   :  { %828 = vmatpush.bf16.msra.mxu1 %v1411_v56 }
  0x6b   :  { %816 = vmatpush.bf16.msra.mxu0 %v1339_v58 }
  0x6c   :  { %854 = vmatpush.bf16.msrb.mxu2 %v1539_v57 }
  0x6d   :  { %842 = vmatpush.bf16.msra.mxu3 %v1467_v62 }
  0x6e   :  { %829 = vmatpush.bf16.msra.mxu1 %v1403_v2  ;;  %817 = vmatmul.bf16.vlgmr.msra.gmra.mxu0 %v1998_v55  ;;  %v1811_v55 = vld [vmem:[#allocation5 + $0x10] sm:$0xff] }
  0x6f   :  { %868 = vmatpush.bf16.msrb.mxu0 %v1595_v1 }
  0x70   :  { %843 = vmatmul.bf16.vlgmr.msra.gmra.mxu3 %v2020_v34  ;;  %855 = vmatpush.bf16.msrb.mxu2 %v1531_v3  ;;  %v1810_v34 = vld [vmem:[#allocation5 + $0x8] sm:$0xff] }
  0x71   :  { %830 = vmatmul.bf16.vlgmr.msra.gmra.mxu1 %v2002_v5  ;;  %1023 = vmatpush.bf16.msrb.mxu3 %v1824_v6  ;;  %v1844_v6 = vld [vmem:[%s2089_s4] ss:$0 sm:$0xff] }
  0x72   :  { %1010 = vmatpush.bf16.msrb.mxu1 %v1816_v4 }
  0x73   :  { %856 = vmatmul.bf16.vlgmr.msrb.gmra.mxu2 %v2022_v41  ;;  %v1809_v41 = vld [vmem:[#allocation5] sm:$0xff] }
  0x75   :  { %1024 = vmatpush.bf16.msrb.mxu3 %v1823_v17 }
  0x76   :  { %1011 = vmatpush.bf16.msrb.mxu1 %v1815_v7  ;;  %v1832_v7 = vld [vmem:[%s2090_s5 + $0x38] sm:$0xff] }
  0x77   :  { %1106 = vmatpush.bf16.msra.mxu0 %v1832_v7 }
  0x79   :  { %1025 = vmatpush.bf16.msrb.mxu3 %v1822_v23 }
  0x7a   :  { %1012 = vmatpush.bf16.msrb.mxu1 %v1814_v8  ;;  %v1831_v8 = vld [vmem:[%s2090_s5 + $0x30] sm:$0xff] }
  0x7b   :  { %1107 = vmatpush.bf16.msra.mxu0 %v1831_v8 }
  0x7d   :  { %1026 = vmatpush.bf16.msrb.mxu3 %v1821_v26 }
  0x7e   :  { %1597 = vmatmul.msk.bf16.vlgmr.msrb.gmra.mxu0 %vm688_vm0, %v2013_v46  ;;  %1013 = vmatpush.bf16.msrb.mxu1 %v1813_v9  ;;  %v168_v46 = vld [vmem:[%s2087_s2] sm:$0x3]  ;;  %v1830_v9 = vld [vmem:[%s2090_s5 + $0x28] sm:$0xff] }
  0x7f   :  { %v170_v60 = vperm.slane %v168_v46, 0  ;;  %v171_v47 = vperm.slane %v168_v46, 1  ;;  %1108 = vmatpush.bf16.msra.mxu0 %v1830_v9  ;;  %v1836_v46 = vld [vmem:[%s2092_s7 + $0x18] sm:$0xff] }
  0x80   :  { %1165 = vmatpush.bf16.msra.mxu2 %v1836_v46 }
  0x81   :  { %1027 = vmatpush.bf16.msrb.mxu3 %v1820_v31 }
  0x82   :  { %1014 = vmatpush.bf16.msrb.mxu1 %v1812_v10  ;;  %v1829_v10 = vld [vmem:[%s2090_s5 + $0x20] sm:$0xff] }
  0x83   :  { %1109 = vmatpush.bf16.msra.mxu0 %v1829_v10 }
  0x85   :  { %1028 = vmatpush.bf16.msrb.mxu3 %v1819_v36 }
  0x86   :  { %1015 = vmatpush.bf16.msrb.mxu1 %v1811_v55  ;;  %v1828_v55 = vld [vmem:[%s2090_s5 + $0x18] sm:$0xff] }
  0x87   :  { %1110 = vmatpush.bf16.msra.mxu0 %v1828_v55 }
  0x89   :  { %1029 = vmatpush.bf16.msrb.mxu3 %v1818_v42 }
  0x8a   :  { %1016 = vmatpush.bf16.msrb.mxu1 %v1810_v34  ;;  %v1827_v34 = vld [vmem:[%s2090_s5 + $0x10] sm:$0xff] }
  0x8b   :  { %1111 = vmatpush.bf16.msra.mxu0 %v1827_v34 }
  0x8d   :  { %1030 = vmatpush.bf16.msrb.mxu3 %v1817_v43 }
  0x8e   :  { %1017 = vmatpush.bf16.msrb.mxu1 %v1809_v41  ;;  %v1826_v41 = vld [vmem:[%s2090_s5 + $0x8] sm:$0xff] }
  0x8f   :  { %1112 = vmatpush.bf16.msra.mxu0 %v1826_v41 }
  0xab   :  { %v701_v11 = vpop.f32.mrf.mxu0 }
  0xac   :  { %v702_v18 = vadd.f32 %v701_v11, %v170_v60 }
  0xae   :  { %v714_v5 = vpop.f32.mrf.mxu1 }
  0xaf   :  { %v715_v20 = vadd.f32 %v714_v5, %v702_v18 }
  0xb2   :  { %v727_v12 = vpop.f32.mrf.mxu2 }
  0xb3   :  { %v740_v13 = vpop.f32.mrf.mxu3  ;;  %v703_v14 = vpop.f32.mrf.mxu0  ;;  %v728_v22 = vadd.f32 %v727_v12, %v715_v20  ;;  %v1825_v12 = vld [vmem:[%s2090_s5] sm:$0xff] }
  0xb4   :  { %1113 = vmatpush.bf16.msra.mxu0 %v1825_v12  ;;  %v1834_v14 = vld [vmem:[%s2092_s7 + $0x8] sm:$0xff]  ;;  %v1833_v20 = vld [vmem:[%s2092_s7] sm:$0xff] }
  0xb5   :  { %v741_v24 = vadd.f32 %v740_v13, %v728_v22  ;;  %v1835_v13 = vld [vmem:[%s2092_s7 + $0x10] sm:$0xff] }
  0xb6   :  { %v716_v15 = vpop.f32.mrf.mxu1  ;;  %1166 = vmatpush.bf16.msra.mxu2 %v1835_v13 }
  0xba   :  { %v729_v16 = vpop.f32.mrf.mxu2  ;;  %1167 = vmatpush.bf16.msra.mxu2 %v1834_v14 }
  0xbb   :  { %v742_v19 = vpop.f32.mrf.mxu3 }
  0xbe   :  { %1168 = vmatpush.bf16.msra.mxu2 %v1833_v20 }
  0xc2   :  { %v779_v21 = vpop.f32.mrf.mxu2 }
  0xca   :  { %v781_v28 = vpop.f32.mrf.mxu2 }
  0xcb   :  { %v753_v25 = vpop.f32.mrf.mxu0 }
  0xcc   :  { %v754_v27 = vadd.f32 %v753_v25, %v741_v24 }
  0xce   :  { %v766_v29 = vpop.f32.mrf.mxu1 }
  0xcf   :  { %v767_v30 = vadd.f32 %v766_v29, %v754_v27  ;;  %v1846_v27 = vld [vmem:[%s2093_s8] ss:$0 sm:$0xff] }
  0xd1   :  { %v780_v32 = vadd.f32 %v779_v21, %v767_v30  ;;  %v1845_v21 = vld [vmem:[%s2091_s6] ss:$0 sm:$0xff]  ;;  %s1935_s6 = smov [#allocation7]  }
  0xd2   :  { %s1191_s7 = sshll.u32 %s1935_s6, 4  ;;  %s1192_s7 = int_to_ptr.vmem [resolvable:$true] %s1191_s7 }
  0xd3   :  { %v874_v33 = vmax.f32 %v780_v32, 0.0  ;;  %v755_v35 = vpop.f32.mrf.mxu0  ;;  %v792_v39 = vpop.f32.mrf.mxu3 }
  0xd4   :  { %v793_v48 = vadd.f32 %v792_v39, %v171_v47 }
  0xd5   :  { %v876_v37 = vpack.c.bf16 %v874_v33, %v874_v33 }
  0xd6   :  { %v805_v38 = vpop.f32.mrf.mxu2  ;;  %v768_v40 = vpop.f32.mrf.mxu1 }
  0xd7   :  { %1018 = vmatmul.bf16.vlgmr.msrb.gmra.mxu1 %v876_v37  ;;  %v806_v50 = vadd.f32 %v805_v38, %v793_v48 }
  0xdb   :  { %v794_v45 = vpop.f32.mrf.mxu3 }
  0xde   :  { %v807_v44 = vpop.f32.mrf.mxu2 }
  0xeb   :  { %v818_v49 = vpop.f32.mrf.mxu0 }
  0xec   :  { %v819_v52 = vadd.f32 %v818_v49, %v806_v50 }
  0xee   :  { %v831_v51 = vpop.f32.mrf.mxu1 }
  0xef   :  { %v832_v56 = vadd.f32 %v831_v51, %v819_v52 }
  0xf3   :  { %v844_v53 = vpop.f32.mrf.mxu3  ;;  %v820_v54 = vpop.f32.mrf.mxu0 }
  0xf4   :  { %v845_v58 = vadd.f32 %v844_v53, %v832_v56 }
  0xf6   :  { %v857_v57 = vpop.f32.mrf.mxu2  ;;  %v833_v59 = vpop.f32.mrf.mxu1 }
  0xf7   :  { %v858_v61 = vadd.f32 %v857_v57, %v845_v58 }
  0xfb   :  { %v846_v62 = vpop.f32.mrf.mxu3  ;;  %v870_v63 = vpop.f32.mrf.mxu0 }
  0xfc   :  { %v871_v0 = vadd.f32 %v870_v63, %v858_v61 }
  0xfe   :  { %v859_v1 = vpop.f32.mrf.mxu2  ;;  %v875_v2 = vmax.f32 %v871_v0, 0.0 }
 0x100   :  { %v877_v3 = vpack.c.bf16 %v875_v2, %v875_v2 }
 0x102   :  { %1031 = vmatmul.bf16.vlgmr.msrb.gmra.mxu3 %v877_v3 }
 0x103   :  { %v872_v4 = vpop.f32.mrf.mxu0 }
 0x154   :  { %v1019_v11 = vpop.f32.mrf.mxu1 }
 0x155   :  { %v1020_v15 = vadd.f32 %v1844_v6, %v1019_v11 }
 0x15c   :  { %v1021_v5 = vpop.f32.mrf.mxu1 }
 0x185   :  { %v1032_v60 = vpop.f32.mrf.mxu3 }
 0x186   :  { %v1033_v16 = vadd.f32 %v1032_v60, %v1020_v15 }
 0x188   :  { %v1036_v17 = vmax.f32 %v1033_v16, 0.0 }
 0x18a   :  { %v1037_v18 = vpack.c.bf16 %v1036_v17, %v1036_v17 }
 0x18c   :  { %1114 = vmatmul.bf16.vlgmr.msra.gmra.mxu0 %v1037_v18 }
 0x18d   :  { %v1034_v19 = vpop.f32.mrf.mxu3 }
 0x209   :  { %v1115_v22 = vpop.f32.mrf.mxu0 }
 0x20a   :  { %v1116_v23 = vadd.f32 %v1845_v21, %v1115_v22 }
 0x20c   :  { %v1119_v24 = vmax.f32 %v1116_v23, 0.0 }
 0x20e   :  { %v1120_v25 = vpack.c.bf16 %v1119_v24, %v1119_v24 }
 0x210   :  { %1710 = vmatmul.msk.bf16.vlgmr.msra.gmra.mxu2 %vm1157_vm1, %v1120_v25 }
 0x211   :  { %v1117_v26 = vpop.f32.mrf.mxu0 }
 0x293   :  { %v1170_v28 = vpop.f32.mrf.mxu2 }
 0x294   :  { %v1171_v29 = vadd.f32 %v1846_v27, %v1170_v28 }
 0x296   :  { %1174 = vmax.xlane.f32.xlu0 %v1171_v29 }
 0x29b   :  { %v1172_v30 = vpop.f32.mrf.mxu2 }
 0x309   :  { %v1175_v31 = vpop.xlane.xlu0 %1174 }
 0x30a   :  { %v1176_v32 = vsub.f32 %v1171_v29, %v1175_v31 }
 0x30c   :  { %v1177_v33 = vmul.f32 1.442695, %v1176_v32 }
 0x30e   :  { %1847 = vpow2.f32 %v1177_v33 }
 0x314   :  { %v1848_v35 = vpop.eup %1847 }
 0x315   :  { %1179 = vadd.xlane.f32.xlu0 %v1848_v35 }
 0x388   :  { %v1180_v36 = vpop.xlane.xlu0 %1179 }
 0x389   :  { %1849 = vlog2.f32 %v1180_v36 }
 0x38f   :  { %v1850_v37 = vpop.eup %1849 }
 0x390   :  { %v1182_v38 = vmul.f32 0.6931472, %v1850_v37 }
 0x392   :  { %v1183_v39 = vsub.f32 %v1176_v32, %v1182_v38 }
 0x394   :  { %1185 = vst.msk [vmem:[#allocation7] sm:$0xff] %vm1184_vm2, %v1183_v39 }
 0x395   :  { %1196 = dma.vmem_to_hbm [thread:$0]  %s1192_s7, 128, %s1194_s13, [#allocation4]  }
 0x396   :  { %1927 = dma.done.wait [#allocation4], 128  }
 0x397   :  { %1928 = vsyncadd [#allocation4], 4294967168 }
 0x398   :  { %1201 = vsyncpa [#allocation3], 1 }
 0x399   :  { %1202 = vsyncpa [#allocation6], 1 }
 0x39a   :  { %1203 = vsyncpa [#allocation4], 1 }

</bundles_post_ra>
